<compile_context>
chip_gen: v7x
topology: tpu7x:2x2x1
jax: 0.10.0
libtpu: 0.0.40
codegen_flags: <defaults>
</compile_context>

<pallas_src>
import functools

import jax
import jax.numpy as jnp
from jax.experimental import pallas as pl
from jax.experimental.pallas import tpu as pltpu


def _pick_hw_chunk(hw, max_chunk):
    """Chunk length along HW: full HW if it fits, else a lane-aligned chunk."""
    if hw <= max(max_chunk, 128):
        return hw
    # Multiple of 512 keeps MXU contraction tiles full on v6e/v7x (128 on v5e
    # is implied since 512 % 128 == 0); fall back to 128-steps for tiny caps.
    step = 512 if max_chunk >= 512 else 128
    return max(128, (max_chunk // step) * step)


def _gather_pred_kernel(ind_ref, feat_ref, pred_ref, iota_ref, acc_ref,
                        *, hw_total, tail_mask):
    s = pl.program_id(1)            # HW split (gives megacore work when B == 1)
    j = pl.program_id(2)            # HW chunk within split (reduction axis)
    n_j = pl.num_programs(2)
    c = feat_ref.shape[1]
    hw_chunk = feat_ref.shape[2]

    @pl.when(j == 0)
    def _():
        acc_ref[...] = jnp.zeros_like(acc_ref)
        # Chunk-invariant iota; generated per (batch, split) so every core's
        # scratch is initialized under megacore sharding.
        iota_ref[...] = jax.lax.broadcasted_iota(jnp.int32, iota_ref.shape, 0)

    # Fold the chunk base into the small (1, K) index vector instead of adding
    # it to the big (HWc, K) iota tile every chunk.
    base = (s * n_j + j) * hw_chunk
    ind_local = ind_ref[0] - base                                 # (1, K) int32
    # Compare in 32-bit, pack to bf16 only at the end (0/1 exact in bf16).
    onehot = (iota_ref[...] == ind_local).astype(jnp.bfloat16)    # (HWc, K)

    feat = feat_ref[0]                                            # (C, HWc)
    if tail_mask:
        # cdiv grid: zero feature columns past HW.  Block padding content is
        # unspecified; NaN * 0-one-hot would otherwise poison the accumulator.
        col = jax.lax.broadcasted_iota(jnp.int32, (c, hw_chunk), 1)
        feat = jnp.where(col < (hw_total - base), feat, jnp.zeros_like(feat))

    if feat.dtype == jnp.bfloat16:
        # Already bf16: single exact MXU dot.
        acc_ref[...] += jnp.dot(feat, onehot,
                                preferred_element_type=jnp.float32)
    else:
        # f32 (or other) feature map: hi/lo bf16 split -> two MXU-native dots,
        # gathered values accurate to ~2^-17 relative (one-hot selects single
        # elements, so no cancellation).
        f32 = feat.astype(jnp.float32)
        hi = f32.astype(jnp.bfloat16)
        lo = (f32 - hi.astype(jnp.float32)).astype(jnp.bfloat16)
        acc_ref[...] += jnp.dot(hi, onehot, preferred_element_type=jnp.float32)
        acc_ref[...] += jnp.dot(lo, onehot, preferred_element_type=jnp.float32)

    # Write this (batch, split)'s partial pred^T on its last chunk.
    @pl.when(j == n_j - 1)
    def _():
        pred_ref[0, 0] = acc_ref[...]


def reg_weighted_l1_loss(output, mask, ind, target, *, max_hw_chunk=8192):
    """output: [B, C, H, W], mask: [B, K, C], ind: [B, K] int, target: [B, K, C]."""
    B, C, H, W = output.shape
    K = ind.shape[1]
    HW = H * W

    hw_chunk = _pick_hw_chunk(HW, max_hw_chunk)
    n_chunks = int(pl.cdiv(HW, hw_chunk))
    needs_tail = (HW % hw_chunk) != 0
    # If the batch axis can't feed two TensorCores (v7x), split the HW axis.
    n_split = 2 if (B == 1 and n_chunks >= 2) else 1
    cps = int(pl.cdiv(n_chunks, n_split))

    feat = output.reshape(B, C, HW)            # free reshape, no HBM transpose
    ind3 = ind.astype(jnp.int32).reshape(B, 1, K)

    # VMEM budget from the actual tiles (one-hot temp + iota scratch dominate),
    # capped generation-aware (v7x: 64 MiB per TensorCore).
    fbytes = feat.dtype.itemsize
    vmem_est = (hw_chunk * K * 2           # bf16 one-hot temporary
                + hw_chunk * K * 4         # int32 iota scratch
                + hw_chunk * K * 4         # compare temporary (generous)
                + 2 * C * hw_chunk * fbytes  # double-buffered feat tile
                + 2 * C * hw_chunk * 4     # hi/lo / mask temporaries
                + 8 * C * K * 4 + 8 * K)
    try:
        cap = int(pltpu.get_tpu_info().vmem_capacity_bytes)
    except Exception:  # pragma: no cover - conservative fallback
        cap = 64 << 20
    vmem_limit = int(min(max(2 * vmem_est, 16 << 20), (3 * cap) // 4))

    kernel = functools.partial(_gather_pred_kernel,
                               hw_total=HW, tail_mask=needs_tail)

    pred_t_parts = pl.pallas_call(
        kernel,
        out_shape=jax.ShapeDtypeStruct((B, n_split, C, K), jnp.float32),
        grid_spec=pltpu.PrefetchScalarGridSpec(
            num_scalar_prefetch=0,
            grid=(B, n_split, cps),
            in_specs=[
                pl.BlockSpec((1, 1, K), lambda b, s, j: (b, 0, 0)),       # ind
                pl.BlockSpec(                                             # feat
                    (1, C, hw_chunk),
                    lambda b, s, j: (b, 0, jnp.minimum(s * cps + j,
                                                       n_chunks - 1))),
            ],
            out_specs=pl.BlockSpec((1, 1, C, K), lambda b, s, j: (b, s, 0, 0)),
            scratch_shapes=[pltpu.VMEM((hw_chunk, K), jnp.int32),   # iota
                            pltpu.VMEM((C, K), jnp.float32)],       # pred acc
        ),
        compiler_params=pltpu.CompilerParams(
            dimension_semantics=("parallel", "parallel", "arbitrary"),
            vmem_limit_bytes=vmem_limit),
    )(ind3, feat)

    # Tiny (B*K*C) scalar glue: combine splits, masked L1, normalize.
    pred = jnp.transpose(jnp.sum(pred_t_parts, axis=1), (0, 2, 1))   # (B, K, C)
    m = mask.astype(jnp.float32)
    t = target.astype(jnp.float32)
    return jnp.sum(jnp.abs(pred * m - t * m)) / (jnp.sum(m) + 1e-4)


def _reference_loss(output, mask, ind, target):
    B, C, H, W = output.shape
    feat = jnp.transpose(output, (0, 2, 3, 1)).reshape(B, H * W, C)
    pred = jnp.take_along_axis(feat, ind[..., None].astype(jnp.int32), axis=1)
    m = mask.astype(jnp.float32)
    return jnp.sum(jnp.abs(pred * m - target * m)) / (jnp.sum(m) + 1e-4)


if __name__ == "__main__":
    key = jax.random.PRNGKey(0)
    k1, k2, k3, k4 = jax.random.split(key, 4)

    # Case 1: CenterNet-like small shapes; max_hw_chunk=128 forces 2 HW chunks
    # so the chunked accumulation path is exercised.
    B, C, H, W, K = 2, 4, 16, 16, 8
    output = jax.random.normal(k1, (B, C, H, W), dtype=jnp.float32)
    ind = jax.random.randint(k2, (B, K), 0, H * W, dtype=jnp.int32)
    mask = (jax.random.uniform(k3, (B, K, C)) > 0.3).astype(jnp.float32)
    target = jax.random.normal(k4, (B, K, C), dtype=jnp.float32)

    loss = jax.block_until_ready(
        reg_weighted_l1_loss(output, mask, ind, target, max_hw_chunk=128))
    ref = _reference_loss(output, mask, ind, target)
    assert jnp.allclose(loss, ref, atol=1e-3, rtol=1e-3), (loss, ref)

    # Case 2: B == 1 (HW split across the parallel axis) with HW not divisible
    # by the chunk, exercising the cdiv tail mask and the clamped padded chunk.
    B2, C2, H2, W2, K2 = 1, 3, 20, 18, 8     # HW = 360 -> 128-chunks + tail
    o2 = jax.random.normal(k1, (B2, C2, H2, W2), dtype=jnp.float32)
    i2 = jax.random.randint(k2, (B2, K2), 0, H2 * W2, dtype=jnp.int32)
    m2 = (jax.random.uniform(k3, (B2, K2, C2)) > 0.3).astype(jnp.float32)
    t2 = jax.random.normal(k4, (B2, K2, C2), dtype=jnp.float32)

    loss2 = jax.block_until_ready(
        reg_weighted_l1_loss(o2, m2, i2, t2, max_hw_chunk=128))
    ref2 = _reference_loss(o2, m2, i2, t2)
    assert jnp.allclose(loss2, ref2, atol=1e-3, rtol=1e-3), (loss2, ref2)

    print("KERNEL_OK")
</pallas_src>

<mosaic_0001>
module attributes {stable_mosaic.version = 11 : i64} {
  func.func @_gather_pred_kernel(%arg0: i32, %arg1: i32, %arg2: i32, %arg3: memref<1x1x8xi32, #tpu.memory_space<vmem>>, %arg4: memref<1x4x128xf32, #tpu.memory_space<vmem>>, %arg5: memref<1x1x4x8xf32, #tpu.memory_space<vmem>>, %arg6: memref<128x8xi32, #tpu.memory_space<vmem>>, %arg7: memref<4x8xf32, #tpu.memory_space<vmem>>) attributes {dimension_semantics = [#tpu.dimension_semantics<parallel>, #tpu.dimension_semantics<parallel>, #tpu.dimension_semantics<arbitrary>], iteration_bounds = array<i64: 2, 1, 2>, scalar_prefetch = 0 : i64, scratch_operands = 2 : i64, tpu.core_type = #tpu.core_type<tc>, window_params = [{transform_indices = @transform_0, window_bounds = array<i64: 1, 1, 8>}, {transform_indices = @transform_1, window_bounds = array<i64: 1, 4, 128>}, {transform_indices = @transform_2, window_bounds = array<i64: 1, 1, 4, 8>}]} {
    %c0_i32 = arith.constant 0 : i32
    %0 = arith.cmpi eq, %arg2, %c0_i32 : i32
    %1 = arith.extui %0 : i1 to i32
    %c0_i32_0 = arith.constant 0 : i32
    %2 = arith.cmpi ne, %1, %c0_i32_0 : i32
    scf.if %2 {
      %cst_18 = arith.constant 0.000000e+00 : f32
      %33 = vector.broadcast %cst_18 : f32 to vector<4x8xf32>
      %c0_19 = arith.constant 0 : index
      %c0_20 = arith.constant 0 : index
      %34 = vector.load %arg7[%c0_19, %c0_20] : memref<4x8xf32, #tpu.memory_space<vmem>>, vector<4x8xf32>
      tpu.vector_store %arg7[%c0_19, %c0_20], %33 {strides = array<i32>} : memref<4x8xf32, #tpu.memory_space<vmem>>, vector<4x8xf32>,
      %35 = tpu.iota {dimensions = array<i32: 0>} : vector<128x8xi32>
      %c0_21 = arith.constant 0 : index
      %c0_22 = arith.constant 0 : index
      %36 = vector.load %arg6[%c0_21, %c0_22] : memref<128x8xi32, #tpu.memory_space<vmem>>, vector<128x8xi32>
      tpu.vector_store %arg6[%c0_21, %c0_22], %35 {strides = array<i32>} : memref<128x8xi32, #tpu.memory_space<vmem>>, vector<128x8xi32>,
    } else {
    }
    %c2_i32 = arith.constant 2 : i32
    %3 = arith.muli %arg1, %c2_i32 : i32
    %4 = arith.addi %3, %arg2 : i32
    %c128_i32 = arith.constant 128 : i32
    %5 = arith.muli %4, %c128_i32 : i32
    %c0 = arith.constant 0 : index
    %c0_1 = arith.constant 0 : index
    %c0_2 = arith.constant 0 : index
    %6 = vector.load %arg3[%c0, %c0_1, %c0_2] : memref<1x1x8xi32, #tpu.memory_space<vmem>>, vector<1x1x8xi32>
    %7 = vector.shape_cast %6 : vector<1x1x8xi32> to vector<1x8xi32>
    %8 = vector.broadcast %5 : i32 to vector<1x8xi32>
    %9 = arith.subi %7, %8 : vector<1x8xi32>
    %c0_3 = arith.constant 0 : index
    %c0_4 = arith.constant 0 : index
    %10 = vector.load %arg6[%c0_3, %c0_4] : memref<128x8xi32, #tpu.memory_space<vmem>>, vector<128x8xi32>
    %11 = vector.broadcast %9 : vector<1x8xi32> to vector<128x8xi32>
    %12 = arith.cmpi eq, %10, %11 : vector<128x8xi32>
    %13 = arith.extui %12 : vector<128x8xi1> to vector<128x8xi32>
    %14 = arith.sitofp %13 : vector<128x8xi32> to vector<128x8xf32>
    %15 = arith.truncf %14 : vector<128x8xf32> to vector<128x8xbf16>
    %c0_5 = arith.constant 0 : index
    %c0_6 = arith.constant 0 : index
    %c0_7 = arith.constant 0 : index
    %16 = vector.load %arg4[%c0_5, %c0_6, %c0_7] : memref<1x4x128xf32, #tpu.memory_space<vmem>>, vector<1x4x128xf32>
    %17 = vector.shape_cast %16 : vector<1x4x128xf32> to vector<4x128xf32>
    %18 = arith.truncf %17 : vector<4x128xf32> to vector<4x128xbf16>
    %19 = arith.extf %18 : vector<4x128xbf16> to vector<4x128xf32>
    %20 = arith.subf %17, %19 : vector<4x128xf32>
    %21 = arith.truncf %20 : vector<4x128xf32> to vector<4x128xbf16>
    %c0_8 = arith.constant 0 : index
    %c0_9 = arith.constant 0 : index
    %22 = vector.load %arg7[%c0_8, %c0_9] : memref<4x8xf32, #tpu.memory_space<vmem>>, vector<4x8xf32>
    %cst = arith.constant dense<0.000000e+00> : vector<4x8xf32>
    %23 = tpu.matmul %18, %15, %cst {dimension_numbers = #tpu.dot_dimension_numbers<[1], [0], [0], [1], [0, 0, 1, 1], [], []>} : vector<4x128xbf16>, vector<128x8xbf16>, vector<4x8xf32> -> vector<4x8xf32>
    %24 = arith.addf %22, %23 : vector<4x8xf32>
    %c0_10 = arith.constant 0 : index
    %c0_11 = arith.constant 0 : index
    %25 = vector.load %arg7[%c0_10, %c0_11] : memref<4x8xf32, #tpu.memory_space<vmem>>, vector<4x8xf32>
    tpu.vector_store %arg7[%c0_10, %c0_11], %24 {strides = array<i32>} : memref<4x8xf32, #tpu.memory_space<vmem>>, vector<4x8xf32>,
    %c0_12 = arith.constant 0 : index
    %c0_13 = arith.constant 0 : index
    %26 = vector.load %arg7[%c0_12, %c0_13] : memref<4x8xf32, #tpu.memory_space<vmem>>, vector<4x8xf32>
    %cst_14 = arith.constant dense<0.000000e+00> : vector<4x8xf32>
    %27 = tpu.matmul %21, %15, %cst_14 {dimension_numbers = #tpu.dot_dimension_numbers<[1], [0], [0], [1], [0, 0, 1, 1], [], []>} : vector<4x128xbf16>, vector<128x8xbf16>, vector<4x8xf32> -> vector<4x8xf32>
    %28 = arith.addf %26, %27 : vector<4x8xf32>
    %c0_15 = arith.constant 0 : index
    %c0_16 = arith.constant 0 : index
    %29 = vector.load %arg7[%c0_15, %c0_16] : memref<4x8xf32, #tpu.memory_space<vmem>>, vector<4x8xf32>
    tpu.vector_store %arg7[%c0_15, %c0_16], %28 {strides = array<i32>} : memref<4x8xf32, #tpu.memory_space<vmem>>, vector<4x8xf32>,
    %c1_i32 = arith.constant 1 : i32
    %30 = arith.cmpi eq, %arg2, %c1_i32 : i32
    %31 = arith.extui %30 : i1 to i32
    %c0_i32_17 = arith.constant 0 : i32
    %32 = arith.cmpi ne, %31, %c0_i32_17 : i32
    scf.if %32 {
      %c0_18 = arith.constant 0 : index
      %c0_19 = arith.constant 0 : index
      %33 = vector.load %arg7[%c0_18, %c0_19] : memref<4x8xf32, #tpu.memory_space<vmem>>, vector<4x8xf32>
      %c0_20 = arith.constant 0 : index
      %c0_21 = arith.constant 0 : index
      %c0_22 = arith.constant 0 : index
      %c0_23 = arith.constant 0 : index
      %34 = vector.load %arg5[%c0_20, %c0_21, %c0_22, %c0_23] : memref<1x1x4x8xf32, #tpu.memory_space<vmem>>, vector<1x1x4x8xf32>
      %35 = vector.shape_cast %34 : vector<1x1x4x8xf32> to vector<4x8xf32>
      %36 = vector.shape_cast %33 : vector<4x8xf32> to vector<1x1x4x8xf32>
      tpu.vector_store %arg5[%c0_20, %c0_21, %c0_22, %c0_23], %36 {strides = array<i32>} : memref<1x1x4x8xf32, #tpu.memory_space<vmem>>, vector<1x1x4x8xf32>,
    } else {
    }
    return
  }
  func.func @transform_0(%arg0: i32, %arg1: i32, %arg2: i32) -> (i32, i32, i32) {
    %c0_i32 = arith.constant 0 : i32
    %c0_i32_0 = arith.constant 0 : i32
    %c0_i32_1 = arith.constant 0 : i32
    return %arg0, %c0_i32, %c0_i32_0 : i32, i32, i32
  }
  func.func @transform_1(%arg0: i32, %arg1: i32, %arg2: i32) -> (i32, i32, i32) {
    %c2_i32 = arith.constant 2 : i32
    %0 = arith.muli %arg1, %c2_i32 : i32
    %1 = arith.addi %0, %arg2 : i32
    %c1_i32 = arith.constant 1 : i32
    %2 = arith.minsi %1, %c1_i32 : i32
    %c0_i32 = arith.constant 0 : i32
    %c0_i32_0 = arith.constant 0 : i32
    return %arg0, %c0_i32, %2 : i32, i32, i32
  }
  func.func @transform_2(%arg0: i32, %arg1: i32, %arg2: i32) -> (i32, i32, i32, i32) {
    %c0_i32 = arith.constant 0 : i32
    %c0_i32_0 = arith.constant 0 : i32
    %c0_i32_1 = arith.constant 0 : i32
    return %arg0, %arg1, %c0_i32, %c0_i32_0 : i32, i32, i32, i32
  }
}

</mosaic_0001>

<bundles_post_ra>
// kernel: tpu_custom_call.1
= control target key start
LH: loop header
LB: loop body
LE: loop exit
PB: predicated region body
PF: predicated region fallthrough
CT: control target
= control target key end

     0   :  { %s1399_s0 = inlined_call_operand.hbm [shape: s32[2,1,8], index: 0, kind: input, shape index: {}]   ;;  %s1400_s1 = inlined_call_operand.hbm [shape: f32[2,4,256], index: 1, kind: input, shape index: {}]   ;;  %s1401_s2 = inlined_call_operand.hbm [shape: f32[2,1,4,8], index: 2, kind: output, shape index: {}]  }
   0x1   :  { %1413 = sst [smem:[#allocation18_spill]] %s1399_s0 }
   0x2   :  { %1414 = sst [smem:[#allocation19_spill]] %s1401_s2 }
   0x3   :  { %7 = vsyncpa [#allocation5], 0 }
   0x4   :  { %9 = vsyncpa [#allocation5 + $0x1], 0 }
   0x5   :  { %10 = vsyncpa [#allocation8], 0 }
   0x6   :  { %12 = vsyncpa [#allocation8 + $0x1], 0 }
   0x7   :  { %13 = vsyncpa [#allocation6], 0 }
   0x8   :  { %15 = vsyncpa [#allocation6 + $0x1], 0  ;;  %s1022_s9 = smov 0   ;;  %s1024_s10 = smov 0  }
   0x9   :  { %s1026_s11 = smov 0   ;;  %s1028_s12 = smov 0  }
   0xa   :  { %s1030_s13 = smov 0   ;;  %s1032_s14 = smov 0  }
   0xb   :  { %s1034_s15 = smov 0   ;;  %s1036_s16 = smov 0  }
   0xc   :  { %s1038_s17 = smov 0   ;;  %s1040_s18 = smov 0  }
   0xd   :  { %s1042_s19 = smov 0  }
   0xe LB: > { %1415 = sst [smem:[#allocation13_spill]] %s970_s12  ;;  %s577_s20 = sadd.s32 4294967295, %s998_s19   ;;  %s998_s19 = sphi %s1042_s19, %s21_s19   ;;  %s994_s18 = sphi %s1040_s18, %s1452_s18   ;;  %s990_s17 = sphi %s1038_s17, %s1443_s17   ;;  %s986_s16 = sphi %s1036_s16, %s1451_s16   ;;  %s982_s15 = sphi %s1034_s15, %s1442_s15   ;;  %s978_s14 = sphi %s1032_s14, %s1450_s14   ;;  %s974_s13 = sphi %s1030_s13, %s1449_s13   ;;  %s970_s12 = sphi %s1028_s12, %s1448_s12   ;;  %s966_s11 = sphi %s1026_s11, %s1447_s11   ;;  %s962_s10 = sphi %s1024_s10, %s1446_s10   ;;  %s958_s9 = sphi %s1022_s9, %s1445_s9  }
   0xf   : > { %1416 = sst [smem:[#allocation14_spill]] %s990_s17  ;;  %s578_s21 = sadd.s32 4294967294, %s998_s19  }
  0x10   : > { %s47_s22 = sadd.s32 1, %s978_s14  ;;  %p54_p0 = scmp.ne.s32.totalorder %s978_s14, %s974_s13 }
  0x11   : > { %p1403_p1 = scmp.eq.s32.totalorder %s998_s19, 0  ;;  %p60_p2 = scmp.ne.s32.totalorder %s974_s13, %s970_s12 }
  0x12   : > { %p1085_p3 = scmp.eq.s32.totalorder %s577_s20, 0  ;;  %p122_p4 = scmp.eq.s32.totalorder %s577_s20, 3 }
  0x13   : > { %p56_p5 = por %p1403_p1, %p54_p0  ;;  %p128_p6 = scmp.eq.s32.totalorder %s578_s21, 3 }
  0x14   : > { %p1093_p7 = por %p1085_p3, %p60_p2  ;;  %p1097_p8 = por %p122_p4, %p54_p0 }
  0x15   : > { %p1101_p9 = por %p128_p6, %p60_p2  ;;  %p1402_p10 = scmp.lt.s32.totalorder %s998_s19, 4 }
  0x16   : > { %s1418_s24 = scalar_select %p1093_p7, 1, 0 }
  0x17   : > { %s1419_s25 = scalar_select %p1097_p8, 1, 0 }
  0x18   : > { %s1420_s26 = scalar_select %p1101_p9, 1, 0 }
  0x19   : > { %s148_s27 = sand.u32 1, %s978_s14   ;;  %s581_s28 = sshll.u32 %s994_s18, 4 }
  0x1a   : > { %1421 = sst [smem:[#allocation15_spill]] %s1420_s26  ;;  %s151_s29 = scalar_lea.vmem [#allocation4], %s148_s27 }
  0x1b   : > { %s158_s30 = sshll.u32 %s151_s29, 4  ;;  %s1422_s0 = sld [smem:[#allocation18_spill]]  ;;  %s1113_s30 = int_to_ptr.vmem [resolvable:$true] %s158_s30 }
  0x1c   : > { %p1117_p11 = pnand %p1402_p10, %p56_p5  ;;  %s149_s7 = scalar_lea.sflag [#allocation5], %s148_s27 }
  0x1e   : > { %p814_p2 = pneg %p1117_p11 }
  0x21   : > { %s1111_s5 = scalar_lea.hbm %s1422_s0, %s581_s28  ;;  %s817_s28 = scalar_lea.hbm %s1422_s0, 32 }
  0x22   : > { %s812_s8 = scalar_lea.hbm %s1111_s5, 16  ;;  %p818_p5 = scmp.lt.u32.totalorder %s1111_s5, %s1422_s0 }
  0x23   : > { %p813_p0 = scmp.ne.s32.totalorder %s1111_s5, %s812_s8  ;;  %p819_p10 = scmp.lt.u32.totalorder %s817_s28, %s812_s8 }
  0x24   : > { %p821_p12 = scmp.lt.u32.totalorder %s812_s8, %s1111_s5 }
  0x25   : > { %p815_p4 = pnand %p814_p2, %p813_p0  ;;  %p820_p1 = por %p819_p10, %p818_p5 }
  0x27   : > { %p816_p6 = pneg %p815_p4  ;;  %p822_p13 = por %p821_p12, %p820_p1 }
  0x29   : > { %p823_p9 = pnand %p822_p13, %p816_p6 }
  0x2b   : > { %826 = shalt.err (!%p823_p9)
}
  0x2c   : > { %s827_s27 = scalar_lea.vmem %s1113_s30, 16  ;;  %s1000_s4 = smov [#allocation4]  }
  0x2d   : > { %p828_p0 = scmp.ne.s32.totalorder %s1113_s30, %s827_s27  ;;  %s832_s20 = sshll.u32 %s1000_s4, 4  ;;  %s833_s20 = int_to_ptr.vmem [resolvable:$false] %s832_s20 }
  0x2e   : > { %s834_s21 = scalar_lea.vmem %s833_s20, 32  ;;  %p835_p7 = scmp.lt.s32.totalorder %s1113_s30, %s833_s20 }
  0x2f   : > { %p830_p4 = pnand %p828_p0, %p814_p2  ;;  %p836_p10 = scmp.lt.s32.totalorder %s834_s21, %s827_s27 }
  0x31   : > { %p831_p8 = pneg %p830_p4  ;;  %p837_p5 = por %p836_p10, %p835_p7 }
  0x33   : > { %p838_p1 = pnand %p837_p5, %p831_p8 }
  0x35   : > { %841 = shalt.err (!%p838_p1)
}
  0x36   : > { %710 = dma.hbm_to_vmem [thread:$0]  (!%p1117_p11), %s1111_s5, 16, %s1113_s30, %s149_s7  }
  0x37   : > { %p1424_p7 = scmp.lt.s32.totalorder %s998_s19, 5  ;;  %p1425_p8 = scmp.ge.s32.totalorder %s998_s19, 1 }
  0x38   : > { %s33_s8 = sadd.s32 1, %s990_s17  ;;  %s40_s28 = sadd.s32 1, %s994_s18 }
  0x39   : > { %p1152_p9 = pnand %p1425_p8, %p1424_p7  ;;  %p34_p12 = scmp.ge.s32.totalorder %s33_s8, 2 }
  0x3a   : > { %p72_p13 = scmp.lt.s32.totalorder %s990_s17, 1  ;;  %s83_s29 = sadd.s32 1, %s966_s11 }
  0x3b   : > { %s1454_s8 = smov (%p34_p12, %s33_s8), 0  ;;  %s1456_s28 = smov (!%p34_p12, %s40_s28), %s994_s18 }
  0x3c   : > { %1427 = sst [smem:[#allocation16_spill]] %s1454_s8  ;;  %p42_p11 = scmp.ge.s32.totalorder %s1456_s28, 2 }
  0x3d   : > { %s73_s30 = scalar_select %p72_p13, %s990_s17, 1 }
  0x3e   : > { %p76_p2 = scmp.lt.s32.totalorder %s1454_s8, 1  ;;  %p90_p6 = scmp.ne.s32.totalorder %s966_s11, %s962_s10 }
  0x3f   : > { %p96_p0 = scmp.ne.s32.totalorder %s962_s10, %s958_s9  ;;  %s1458_s28 = smov (%p42_p11, %s1456_s28), 0 }
  0x40   : > { %1428 = sst [smem:[#allocation17_spill]] %s1458_s28  ;;  %s44_s7 = ssub.s32 %s994_s18, %s1458_s28 }
  0x41   : > { %s77_s5 = scalar_select %p76_p2, %s1454_s8, 1 }
  0x42   : > { %p1429_p4 = scmp.eq.s32.totalorder %s998_s19, 0  ;;  %p45_p5 = scmp.eq.s32.totalorder %s44_s7, 0 }
  0x43   : > { %s79_s27 = ssub.s32 %s73_s30, %s77_s5  ;;  %p1182_p1 = por %p96_p0, %p1085_p3 }
  0x44   : > { %p1176_p10 = por %p90_p6, %p1429_p4  ;;  %s80_s4 = sor.u32 %s79_s27, %s44_s7 }
  0x45   : > { %s1431_s20 = scalar_select %p1182_p1, 1, 0 }
  0x46   : > { %s1189_s9 = scalar_select %p45_p5, %s978_s14, %s47_s22  }
  0x47   : > { %p81_p7 = scmp.eq.s32.totalorder %s80_s4, 0  ;;  %s165_s21 = sand.u32 1, %s966_s11  }
  0x48   : > { %s582_s0 = sshll.u32 %s165_s21, 2  ;;  %s583_s8 = sshll.u32 %s994_s18, 1 }
  0x49   : > { %s1193_s28 = scalar_select %p81_p7, %s966_s11, %s83_s29  }
  0x4a   : > { %s178_s17 = sadd.s32 %s583_s8, %s73_s30  ;;  %s169_s26 = scalar_lea.vmem [#allocation7], %s582_s0 }
  0x4b   : > { %s182_s12 = sshll.u32 %s169_s26, 4  ;;  %s584_s2 = sshll.u32 %s178_s17, 6  ;;  %s1196_s12 = int_to_ptr.vmem [resolvable:$true] %s182_s12 }
  0x4c   : > { %s1201_s7 = scalar_lea.hbm %s1400_s1, %s584_s2  ;;  %p1432_p3 = scmp.lt.s32.totalorder %s998_s19, 4 }
  0x4d   : > { %s166_s0 = scalar_lea.sflag [#allocation8], %s165_s21  ;;  %s842_s17 = scalar_lea.hbm %s1201_s7, 64 }
  0x4e   : > { %p1207_p8 = pnand %p1432_p3, %p1176_p10  ;;  %p843_p12 = scmp.ne.s32.totalorder %s1201_s7, %s842_s17 }
  0x4f   : > { %s847_s8 = scalar_lea.hbm %s1400_s1, 256  ;;  %p848_p6 = scmp.lt.u32.totalorder %s1201_s7, %s1400_s1 }
  0x50   : > { %p844_p13 = pneg %p1207_p8  ;;  %p849_p0 = scmp.lt.u32.totalorder %s847_s8, %s842_s17 }
  0x51   : > { %p851_p10 = scmp.lt.u32.totalorder %s842_s17, %s1201_s7 }
  0x52   : > { %p845_p11 = pnand %p844_p13, %p843_p12  ;;  %p850_p4 = por %p849_p0, %p848_p6 }
  0x54   : > { %p846_p2 = pneg %p845_p11  ;;  %p852_p5 = por %p851_p10, %p850_p4 }
  0x56   : > { %p853_p7 = pnand %p852_p5, %p846_p2 }
  0x58   : > { %856 = shalt.err (!%p853_p7)
}
  0x59   : > { %s857_s3 = scalar_lea.vmem %s1196_s12, 64  ;;  %s1001_s27 = smov [#allocation7]  }
  0x5a   : > { %p858_p3 = scmp.ne.s32.totalorder %s1196_s12, %s857_s3  ;;  %s862_s4 = sshll.u32 %s1001_s27, 4  ;;  %s863_s4 = int_to_ptr.vmem [resolvable:$false] %s862_s4 }
  0x5b   : > { %s864_s21 = scalar_lea.vmem %s863_s4, 128  ;;  %p865_p1 = scmp.lt.s32.totalorder %s1196_s12, %s863_s4 }
  0x5c   : > { %p860_p12 = pnand %p858_p3, %p844_p13  ;;  %p866_p6 = scmp.lt.s32.totalorder %s864_s21, %s857_s3 }
  0x5e   : > { %p861_p11 = pneg %p860_p12  ;;  %p867_p0 = por %p866_p6, %p865_p1 }
  0x60   : > { %p868_p4 = pnand %p867_p0, %p861_p11 }
  0x62   : > { %871 = shalt.err (!%p868_p4)
}
  0x63   : > { %713 = dma.hbm_to_vmem [thread:$0]  (!%p1207_p8), %s1201_s7, 64, %s1196_s12, %s166_s0  }
  0x64   : > { %191 = sbr.rel (%p1152_p9) target bundleno = 427 (0x1ab), region = 28  ;;  %s1239_s23 = sand.u32 (!%p1152_p9), 1, %s974_s13  }
  0x65   : > { %s194_s5 = scalar_lea.sflag (!%p1152_p9), [#allocation5], %s1239_s23  ;;  %s196_s17 = scalar_lea.vmem (!%p1152_p9), [#allocation4], %s1239_s23 }
  0x66   : > { %p1434_p13 = scmp.ne.s32.totalorder (!%p1152_p9), %s1418_s24, 0 }
  0x6b   : > { %945 = dma.done.wait (%p1434_p13), %s194_s5, 16  }
  0x6c   : > { %947 = vsyncadd (%p1434_p13), %s194_s5, 4294967280  ;;  %s201_s22 = sand.u32 1, %s962_s10   ;;  %p1435_p9 = scmp.ne.s32.totalorder %s1431_s20, 0 }
  0x6d   : > { %s1248_s12 = sshll.u32 %s201_s22, 2  ;;  %s202_s6 = scalar_lea.sflag [#allocation8], %s201_s22 }
  0x6e   : > { %s205_s7 = scalar_lea.vmem [#allocation7], %s1248_s12 }
  0x6f   : > { %949 = dma.done.wait (%p1435_p9), %s202_s6, 64  }
  0x70   : > { %951 = vsyncadd (%p1435_p9), %s202_s6, 4294967232  ;;  %s587_s0 = sshll.u32 %s1239_s23, 2  ;;  %p588_p1 = scmp.ne.s32.totalorder %s982_s15, 0 }
  0x71   : > { %s1256_s2 = scalar_lea.vmem [#allocation9], %s587_s0  ;;  %vm239_vm0 = vcmask (!%p588_p1), 60416   ;;  %v241_v0 = vlaneseq (!%p588_p1)  ;;  %v1002_v1 = vmov (!%p588_p1), 0.0   ;;  %vm258_vm1 = vcmask (!%p588_p1), 64512  }
  0x72   : > { %238 = sbr.rel (%p588_p1) target bundleno = 127 (0x7f), region = 40  ;;  %240 = vst.msk [vmem:[#allocation3] sm:$0xf] (!%p588_p1), %vm239_vm0, %v1002_v1 }
  0x73   : > { %v242_v2 = vshrl.u32 (!%p588_p1), %v241_v0, 7 }
  0x75   : > { %259 = vst.msk [vmem:[#allocation2] sm:$0xff] (!%p588_p1), %vm258_vm1, %v242_v2  ;;  %v243_v3 = vadd.s32 (!%p588_p1), 8, %v242_v2  ;;  %v244_v4 = vadd.s32 (!%p588_p1), 16, %v242_v2  ;;  %v245_v5 = vadd.s32 (!%p588_p1), 24, %v242_v2  ;;  %v246_v6 = vadd.s32 (!%p588_p1), 32, %v242_v2 }
  0x76   : > { %v247_v7 = vadd.s32 (!%p588_p1), 40, %v242_v2  ;;  %v248_v8 = vadd.s32 (!%p588_p1), 48, %v242_v2  ;;  %v249_v9 = vadd.s32 (!%p588_p1), 56, %v242_v2  ;;  %v250_v10 = vadd.s32 (!%p588_p1), 64, %v242_v2 }
  0x77   : > { %260 = vst.msk [vmem:[#allocation2 + $0x8] sm:$0xff] (!%p588_p1), %vm258_vm1, %v243_v3  ;;  %261 = vst.msk [vmem:[#allocation2 + $0x10] sm:$0xff] (!%p588_p1), %vm258_vm1, %v244_v4  ;;  %v251_v11 = vadd.s32 (!%p588_p1), 72, %v242_v2  ;;  %v252_v12 = vadd.s32 (!%p588_p1), 80, %v242_v2  ;;  %v253_v13 = vadd.s32 (!%p588_p1), 88, %v242_v2  ;;  %v254_v14 = vadd.s32 (!%p588_p1), 96, %v242_v2 }
  0x78   : > { %262 = vst.msk [vmem:[#allocation2 + $0x18] sm:$0xff] (!%p588_p1), %vm258_vm1, %v245_v5  ;;  %263 = vst.msk [vmem:[#allocation2 + $0x20] sm:$0xff] (!%p588_p1), %vm258_vm1, %v246_v6  ;;  %v255_v15 = vadd.s32 (!%p588_p1), 104, %v242_v2  ;;  %v256_v16 = vadd.s32 (!%p588_p1), 112, %v242_v2  ;;  %v257_v17 = vadd.s32 (!%p588_p1), 120, %v242_v2 }
  0x79   : > { %264 = vst.msk [vmem:[#allocation2 + $0x28] sm:$0xff] %vm258_vm1, %v247_v7  ;;  %265 = vst.msk [vmem:[#allocation2 + $0x30] sm:$0xff] %vm258_vm1, %v248_v8 }
  0x7a   : > { %266 = vst.msk [vmem:[#allocation2 + $0x38] sm:$0xff] %vm258_vm1, %v249_v9  ;;  %267 = vst.msk [vmem:[#allocation2 + $0x40] sm:$0xff] %vm258_vm1, %v250_v10 }
  0x7b   : > { %268 = vst.msk [vmem:[#allocation2 + $0x48] sm:$0xff] %vm258_vm1, %v251_v11  ;;  %269 = vst.msk [vmem:[#allocation2 + $0x50] sm:$0xff] %vm258_vm1, %v252_v12 }
  0x7c   : > { %270 = vst.msk [vmem:[#allocation2 + $0x58] sm:$0xff] %vm258_vm1, %v253_v13  ;;  %271 = vst.msk [vmem:[#allocation2 + $0x60] sm:$0xff] %vm258_vm1, %v254_v14 }
  0x7d   : > { %272 = vst.msk [vmem:[#allocation2 + $0x68] sm:$0xff] %vm258_vm1, %v255_v15  ;;  %273 = vst.msk [vmem:[#allocation2 + $0x70] sm:$0xff] %vm258_vm1, %v256_v16 }
  0x7e   : > { %274 = vst.msk [vmem:[#allocation2 + $0x78] sm:$0xff] %vm258_vm1, %v257_v17 }
  0x7f PF: > { %s589_s24 = sshll.u32 %s982_s15, 7  ;;  %v278_v18 = vld [vmem:[%s196_s17] sm:$0x1]  ;;  %v297_v19 = vlaneseq  ;;  %v1003_v20 = vmov 0.0   ;;  %vm1004_vm2 = vmmov 0   ;;  %p638_p8 = scmp.ne.s32.totalorder %s982_s15, 1 }
  0x80   : > { %661 = vmatprep.subr.bf16.mxu0 %v1003_v20  ;;  %v279_v21 = vstv %s589_s24  ;;  %681 = vmatprep.subr.bf16.mxu1 %v1003_v20  ;;  %v1005_v32 = vmov 1.0|1.0   ;;  %v357_v39 = vld [vmem:[%s205_s7] sm:$0xf]  ;;  %v362_v48 = vld [vmem:[#allocation3] sm:$0xf] }
  0x81   : > { %v280_v22 = vsub.s32 %v278_v18, %v279_v21  ;;  %v298_v23 = vshrl.u32 %v297_v19, 7  ;;  %677 = vmatprep.mubr.msk.bf16.mxu0 %vm1004_vm2, %v1003_v20  ;;  %697 = vmatprep.mubr.msk.bf16.mxu1 %vm1004_vm2, %v1003_v20  ;;  %v288_v34 = vld [vmem:[#allocation2 + $0x38] sm:$0xff]  ;;  %v289_v35 = vld [vmem:[#allocation2 + $0x40] sm:$0xff]  ;;  %v358_v42 = vpack.c.bf16 %v357_v39, %v357_v39 }
  0x82   : > { %v281_v24 = vld [vmem:[#allocation2] sm:$0xff]  ;;  %v290_v36 = vld [vmem:[#allocation2 + $0x48] sm:$0xff]  ;;  %v291_v37 = vld [vmem:[#allocation2 + $0x50] sm:$0xff] }
  0x83   : > { %v299_v25 = vsub.s32 0, %v298_v23  ;;  %v292_v38 = vld [vmem:[#allocation2 + $0x58] sm:$0xff]  ;;  %v293_v40 = vld [vmem:[#allocation2 + $0x60] sm:$0xff]  ;;  %v359_v45 = vunpack.c.l.bf16 %v358_v42 }
  0x84   : > { %v282_v26 = vld [vmem:[#allocation2 + $0x8] sm:$0xff]  ;;  %v283_v27 = vld [vmem:[#allocation2 + $0x10] sm:$0xff] }
  0x85   : > { %v284_v28 = vld [vmem:[#allocation2 + $0x18] sm:$0xff]  ;;  %v1282_v29 = vrot.slane %v280_v22, %v299_v25  ;;  %v285_v30 = vld [vmem:[#allocation2 + $0x20] sm:$0xff]  ;;  %v294_v41 = vld [vmem:[#allocation2 + $0x68] sm:$0xff]  ;;  %v360_v46 = vsub.f32 %v357_v39, %v359_v45 }
  0x86   : > { %v286_v31 = vld [vmem:[#allocation2 + $0x28] sm:$0xff]  ;;  %v287_v33 = vld [vmem:[#allocation2 + $0x30] sm:$0xff]  ;;  %v296_v44 = vld [vmem:[#allocation2 + $0x78] sm:$0xff] }
  0x87   : > { %vm301_vm3 = vcmp.eq.s32.totalorder %v281_v24, %v1282_v29  ;;  %vm302_vm4 = vcmp.eq.s32.totalorder %v282_v26, %v1282_v29  ;;  %vm303_vm5 = vcmp.eq.s32.totalorder %v283_v27, %v1282_v29  ;;  %vm304_vm6 = vcmp.eq.s32.totalorder %v284_v28, %v1282_v29  ;;  %v295_v43 = vld [vmem:[#allocation2 + $0x70] sm:$0xff] }
  0x88   : > { %vm606_vm7 = vmpackc.low %vm302_vm4, %vm301_vm3  ;;  %vm305_vm9 = vcmp.eq.s32.totalorder %v285_v30, %v1282_v29  ;;  %vm306_vm10 = vcmp.eq.s32.totalorder %v286_v31, %v1282_v29  ;;  %vm307_vm12 = vcmp.eq.s32.totalorder %v287_v33, %v1282_v29  ;;  %vm308_vm13 = vcmp.eq.s32.totalorder %v288_v34, %v1282_v29 }
  0x89   : > { %662 = vmatpush3.bf16.msk.msra.mxu0 %vm606_vm7, %v1005_v32  ;;  %682 = vmatpush3.bf16.msk.msra.mxu1 %vm606_vm7, %v1005_v32  ;;  %vm608_vm8 = vmpackc.low %vm304_vm6, %vm303_vm5  ;;  %vm309_vm15 = vcmp.eq.s32.totalorder %v289_v35, %v1282_v29  ;;  %vm310_vm0 = vcmp.eq.s32.totalorder %v290_v36, %v1282_v29  ;;  %vm311_vm2 = vcmp.eq.s32.totalorder %v291_v37, %v1282_v29 }
  0x8a   : > { %663 = vmatprep.subr.bf16.mxu0 %v1003_v20  ;;  %683 = vmatprep.subr.bf16.mxu1 %v1003_v20  ;;  %vm610_vm11 = vmpackc.low %vm306_vm10, %vm305_vm9  ;;  %vm312_vm3 = vcmp.eq.s32.totalorder %v292_v38, %v1282_v29  ;;  %vm313_vm5 = vcmp.eq.s32.totalorder %v293_v40, %v1282_v29  ;;  %vm314_vm6 = vcmp.eq.s32.totalorder %v294_v41, %v1282_v29 }
  0x8b   : > { %vm612_vm14 = vmpackc.low %vm308_vm13, %vm307_vm12  ;;  %vm316_vm9 = vcmp.eq.s32.totalorder %v296_v44, %v1282_v29  ;;  %v361_v47 = vpack.c.bf16 %v360_v46, %v360_v46 }
  0x8c   : > { %vm614_vm1 = vmpackc.low %vm310_vm0, %vm309_vm15 }
  0x8d   : > { %664 = vmatpush3.bf16.msk.msra.mxu0 %vm608_vm8, %v1005_v32  ;;  %684 = vmatpush3.bf16.msk.msra.mxu1 %vm608_vm8, %v1005_v32  ;;  %vm616_vm4 = vmpackc.low %vm312_vm3, %vm311_vm2  ;;  %vm315_vm8 = vcmp.eq.s32.totalorder %v295_v43, %v1282_v29 }
  0x8e   : > { %665 = vmatprep.subr.bf16.mxu0 %v1003_v20  ;;  %685 = vmatprep.subr.bf16.mxu1 %v1003_v20  ;;  %vm618_vm7 = vmpackc.low %vm314_vm6, %vm313_vm5 }
  0x8f   : > { %vm620_vm10 = vmpackc.low %vm316_vm9, %vm315_vm8 }
  0x91   : > { %666 = vmatpush3.bf16.msk.msra.mxu0 %vm610_vm11, %v1005_v32  ;;  %686 = vmatpush3.bf16.msk.msra.mxu1 %vm610_vm11, %v1005_v32  ;;  %vm404_vm11 = vcmask 60416  }
  0x92   : > { %667 = vmatprep.subr.bf16.mxu0 %v1003_v20  ;;  %687 = vmatprep.subr.bf16.mxu1 %v1003_v20 }
  0x95   : > { %668 = vmatpush3.bf16.msk.msra.mxu0 %vm612_vm14, %v1005_v32  ;;  %688 = vmatpush3.bf16.msk.msra.mxu1 %vm612_vm14, %v1005_v32 }
  0x96   : > { %669 = vmatprep.subr.bf16.mxu0 %v1003_v20  ;;  %689 = vmatprep.subr.bf16.mxu1 %v1003_v20 }
  0x99   : > { %670 = vmatpush3.bf16.msk.msra.mxu0 %vm614_vm1, %v1005_v32  ;;  %690 = vmatpush3.bf16.msk.msra.mxu1 %vm614_vm1, %v1005_v32 }
  0x9a   : > { %671 = vmatprep.subr.bf16.mxu0 %v1003_v20  ;;  %691 = vmatprep.subr.bf16.mxu1 %v1003_v20 }
  0x9d   : > { %672 = vmatpush3.bf16.msk.msra.mxu0 %vm616_vm4, %v1005_v32  ;;  %692 = vmatpush3.bf16.msk.msra.mxu1 %vm616_vm4, %v1005_v32 }
  0x9e   : > { %673 = vmatprep.subr.bf16.mxu0 %v1003_v20  ;;  %693 = vmatprep.subr.bf16.mxu1 %v1003_v20 }
  0xa1   : > { %674 = vmatpush3.bf16.msk.msra.mxu0 %vm618_vm7, %v1005_v32  ;;  %694 = vmatpush3.bf16.msk.msra.mxu1 %vm618_vm7, %v1005_v32 }
  0xa2   : > { %675 = vmatprep.subr.bf16.mxu0 %v1003_v20  ;;  %695 = vmatprep.subr.bf16.mxu1 %v1003_v20 }
  0xa5   : > { %676 = vmatpush3.bf16.msk.msra.mxu0 %vm620_vm10, %v1005_v32  ;;  %696 = vmatpush3.bf16.msk.msra.mxu1 %vm620_vm10, %v1005_v32 }
  0xa8   : > { %678 = vmatmul.mubr.bf16.vlgmr.msra.gmra.mrb[0].mxu0 %v358_v42  ;;  %698 = vmatmul.mubr.bf16.vlgmr.msra.gmra.mrb[0].mxu1 %v361_v47 }
 0x17b   : > { %v397_v49 = vpop.f32.mrb[0].mxu0  ;;  %v441_v50 = vpop.f32.mrb[0].mxu1 }
 0x17c   : > { %v403_v51 = vadd.f32 %v397_v49, %v362_v48  ;;  %v679_v52 = vpop.f32.mrb[1].mxu0  ;;  %v699_v53 = vpop.f32.mrb[1].mxu1 }
 0x17d   : > { %v400_v54 = vpop.f32.mrb[2].mxu0  ;;  %v444_v55 = vpop.f32.mrb[2].mxu1 }
 0x17e   : > { %405 = vst.msk [vmem:[#allocation3] sm:$0xf] %vm404_vm11, %v403_v51  ;;  %v680_v56 = vpop.f32.mrb[3].mxu0  ;;  %v700_v57 = vpop.f32.mrb[3].mxu1 }
 0x182   : > { %452 = sbr.rel (%p638_p8) target bundleno = 401 (0x191), region = 44 }
 0x185   : > { %v406_v58 = vld [vmem:[#allocation3] sm:$0xf] }
 0x186   : > { %v447_v59 = vadd.f32 %v441_v50, %v406_v58 }
 0x188   : > { %448 = vst.msk [vmem:[#allocation3] sm:$0xf] %vm404_vm11, %v447_v59 }
 0x18f   : > { %v453_v60 = vld [vmem:[#allocation3] sm:$0xf] }
 0x190   : > { %454 = vst.msk [vmem:[%s1256_s2] sm:$0xf] %vm404_vm11, %v453_v60 }
 0x191 PF: > { %s640_s20 = sshll.u32 %s986_s16, 6  ;;  %s1436_s29 = sld [smem:[#allocation19_spill]] }
 0x192   : > { %s470_s3 = sshll.u32 %s1256_s2, 4  ;;  %s456_s27 = scalar_lea.sflag [#allocation6], %s1239_s23  ;;  %s471_s3 = int_to_ptr.vmem [resolvable:$true] %s470_s3 }
 0x193   : > { %s872_s15 = scalar_lea.vmem %s471_s3, 64  ;;  %p1437_p10 = scmp.ne.s32.totalorder %s1419_s25, 0 }
 0x194   : > { %p873_p2 = scmp.ne.s32.totalorder %s471_s3, %s872_s15  ;;  %s1006_s4 = smov [#allocation9]  }
 0x195   : > { %s876_s21 = sshll.u32 %s1006_s4, 4  ;;  %s877_s21 = int_to_ptr.vmem [resolvable:$false] %s876_s21 }
 0x196   : > { %p874_p5 = pnand %p873_p2, %p1437_p10  ;;  %s878_s5 = scalar_lea.vmem %s877_s21, 128 }
 0x197   : > { %s1341_s30 = scalar_lea.hbm %s1436_s29, %s640_s20  ;;  %p879_p3 = scmp.lt.s32.totalorder %s471_s3, %s877_s21 }
 0x198   : > { %p875_p7 = pneg %p874_p5  ;;  %p880_p12 = scmp.lt.s32.totalorder %s878_s5, %s872_s15 }
 0x19a   : > { %p881_p11 = por %p880_p12, %p879_p3 }
 0x19c   : > { %p882_p6 = pnand %p881_p11, %p875_p7 }
 0x19e   : > { %885 = shalt.err (!%p882_p6)
}
 0x19f   : > { %s886_s16 = scalar_lea.hbm %s1341_s30, 64  ;;  %s890_s22 = scalar_lea.hbm %s1436_s29, 128 }
 0x1a0   : > { %p887_p0 = scmp.ne.s32.totalorder %s1341_s30, %s886_s16  ;;  %p891_p9 = scmp.lt.u32.totalorder %s1341_s30, %s1436_s29 }
 0x1a1   : > { %p892_p1 = scmp.lt.u32.totalorder %s890_s22, %s886_s16  ;;  %p894_p2 = scmp.lt.u32.totalorder %s886_s16, %s1341_s30 }
 0x1a2   : > { %p888_p4 = pnand %p887_p0, %p1437_p10 }
 0x1a3   : > { %p893_p8 = por %p892_p1, %p891_p9 }
 0x1a4   : > { %p889_p13 = pneg %p888_p4 }
 0x1a5   : > { %p895_p5 = por %p894_p2, %p893_p8 }
 0x1a7   : > { %p896_p7 = pnand %p895_p5, %p889_p13 }
 0x1a9   : > { %899 = shalt.err (!%p896_p7)
}
 0x1aa   : > { %705 = dma.vmem_to_hbm [thread:$0]  (%p1437_p10), %s471_s3, 64, %s1341_s30, %s456_s27  }
 0x1ab PF: > { %s1438_s7 = sld [smem:[#allocation13_spill]]  ;;  %s1439_s0 = sld [smem:[#allocation15_spill]] }
 0x1ac   : > { %p719_p3 = scmp.ge.s32.totalorder %s998_s19, 2 }
 0x1b1   : > { %s482_s2 = sand.u32 1, %s1438_s7   ;;  %p1440_p12 = scmp.ne.s32.totalorder %s1439_s0, 0 }
 0x1b2   : > { %s483_s24 = scalar_lea.sflag [#allocation6], %s482_s2 }
 0x1b3   : > { %p715_p11 = pnand %p719_p3, %p1440_p12 }
 0x1b5   : > { %953 = dma.done.wait (!%p715_p11), %s483_s24, 64  }
 0x1b6   : > { %955 = vsyncadd (!%p715_p11), %s483_s24, 4294967232  ;;  %s21_s19 = sadd.s32 1, %s998_s19   ;;  %s1441_s25 = smov %s1189_s9 }
 0x1b7   : > { %p18_p6 = scmp.ge.s32.totalorder %s21_s19, 6   ;;  %s1442_s15 = sld [smem:[#allocation14_spill]] }
 0x1b8   : > { %s1443_s17 = sld [smem:[#allocation16_spill]]  ;;  %s1444_s20 = sld [smem:[#allocation17_spill]] }
 0x1b9   : > { %s1445_s9 = smov %s962_s10  ;;  %s1446_s10 = smov %s966_s11 }
 0x1ba   : > { %s1447_s11 = smov %s1193_s28  ;;  %s1448_s12 = smov %s974_s13 }
 0x1bb   : > { %s1449_s13 = smov %s978_s14  ;;  %s1450_s14 = smov %s1441_s25 }
 0x1bc   : > { %s1451_s16 = smov %s994_s18  ;;  %20 = sbr.rel (!%p18_p6) target bundleno = 14 (0xe), region = 94 }
 0x1be   : > { %s1452_s18 = smov %s1444_s20 }
 0x1c3   :  { %488 = vsyncpa [#allocation5], 1 }
 0x1c4   :  { %490 = vsyncpa [#allocation5 + $0x1], 1 }
 0x1c5   :  { %491 = vsyncpa [#allocation8], 1 }
 0x1c6   :  { %493 = vsyncpa [#allocation8 + $0x1], 1 }
 0x1c7   :  { %494 = vsyncpa [#allocation6], 1 }
 0x1c8   :  { %496 = vsyncpa [#allocation6 + $0x1], 1 }

</bundles_post_ra>
